<compile_context>
chip_gen: v5e
topology: v5e:2x2
jax: 0.10.0
libtpu: 0.0.40
codegen_flags: <defaults>
</compile_context>

<pallas_src>
import math
import jax
import jax.numpy as jnp
from jax import lax
from jax.experimental import pallas as pl
from jax.experimental.pallas import tpu as pltpu


def _round_up(n, m):
    return ((n + m - 1) // m) * m


def _erf(x):
    # Abramowitz & Stegun 7.1.26 rational approximation of erf, |err| <= 1.5e-7.
    # Uses only abs/exp/mul/add/where so it lowers cleanly in Mosaic.
    p = 0.3275911
    a1, a2, a3, a4, a5 = (0.254829592, -0.284496736, 1.421413741,
                          -1.453152027, 1.061405429)
    ax = jnp.abs(x)
    t = 1.0 / (1.0 + p * ax)
    poly = ((((a5 * t + a4) * t + a3) * t + a2) * t + a1) * t
    y = 1.0 - poly * jnp.exp(-ax * ax)
    return jnp.where(x < 0.0, -y, y)


def _gelu_exact(x):
    # PyTorch nn.GELU() default (exact, erf-based): 0.5*x*(1+erf(x/sqrt(2)))
    return 0.5 * x * (1.0 + _erf(x * (1.0 / math.sqrt(2.0))))


def slice_mlp_kernel(x_ref, w1_ref, b1_ref, w2_ref, b2_ref, w3t_ref, b3_ref, o_ref):
    x = x_ref[...].astype(jnp.bfloat16)                                    # [TM, 2H]
    # fc1 + GELU (bf16 MXU inputs, f32 accumulate / activation)
    h = jnp.dot(x, w1_ref[...], preferred_element_type=jnp.float32) + b1_ref[...]
    h = _gelu_exact(h)
    # TODO(synk): dropout is identity in inference mode (no RNG mask applied).
    # fc2 + GELU
    h = jnp.dot(h.astype(jnp.bfloat16), w2_ref[...],
                preferred_element_type=jnp.float32) + b2_ref[...]
    h = _gelu_exact(h)
    # fc3 + sigmoid: contract w3^T [1,H] with h [TM,H] over H -> lane-dense [1,TM]
    z = lax.dot_general(w3t_ref[...], h.astype(jnp.bfloat16),
                        (((1,), (1,)), ((), ())),
                        preferred_element_type=jnp.float32)                # [1, TM]
    z = z + b3_ref[...]
    o_ref[...] = jax.nn.sigmoid(z).reshape(o_ref.shape).astype(o_ref.dtype)


def slice_mlp(x, w1, b1, w2, b2, w3, b3, *, tm=1024):
    """x: [N, 2H]; w1: [2H, H]; b1: [1, H]; w2: [H, H]; b2: [1, H];
    w3: [H, 1]; b3: [1, 1]. Returns [N, 1] f32 sigmoid probabilities."""
    N, in_dim = x.shape
    H = w1.shape[1]
    assert in_dim == 2 * H and w2.shape == (H, H) and w3.shape == (H, 1)

    tm = _round_up(max(tm, 8), 8)
    TM = min(tm, _round_up(N, 8))            # row tile, multiple of 8
    num_tiles = pl.cdiv(N, TM)
    N_pad = num_tiles * TM
    if N_pad != N:
        x = jnp.pad(x, ((0, N_pad - N), (0, 0)))

    # bf16 weights for the MXU; biases stay f32 (added post-accumulate).
    w1b = w1.astype(jnp.bfloat16)
    w2b = w2.astype(jnp.bfloat16)
    w3t = w3.T.astype(jnp.bfloat16)          # [1, H]
    b1f = b1.astype(jnp.float32)
    b2f = b2.astype(jnp.float32)
    b3f = b3.astype(jnp.float32)

    const = lambda shape: pl.BlockSpec(shape, lambda i: (0, 0))
    out = pl.pallas_call(
        slice_mlp_kernel,
        out_shape=jax.ShapeDtypeStruct((num_tiles, 1, TM), jnp.float32),
        grid=(num_tiles,),
        in_specs=[
            pl.BlockSpec((TM, in_dim), lambda i: (i, 0)),   # x: batch-tiled
            const(w1b.shape), const(b1f.shape),             # VMEM-resident params
            const(w2b.shape), const(b2f.shape),
            const(w3t.shape), const(b3f.shape),
        ],
        out_specs=pl.BlockSpec((1, 1, TM), lambda i: (i, 0, 0)),
        compiler_params=pltpu.CompilerParams(
            dimension_semantics=("parallel",)),
    )(x, w1b, b1f, w2b, b2f, w3t, b3f)
    return out.reshape(N_pad, 1)[:N]


def init_params(key, hidden_size):
    """Deterministic init mimicking nn.Linear (U(-1/sqrt(fan_in), 1/sqrt(fan_in)))."""
    ks = jax.random.split(key, 6)
    H = hidden_size

    def lin(kw, kb, fan_in, fan_out):
        bound = 1.0 / math.sqrt(fan_in)
        w = jax.random.uniform(kw, (fan_in, fan_out), jnp.float32, -bound, bound)
        b = jax.random.uniform(kb, (1, fan_out), jnp.float32, -bound, bound)
        return w, b

    w1, b1 = lin(ks[0], ks[1], 2 * H, H)
    w2, b2 = lin(ks[2], ks[3], H, H)
    w3, b3 = lin(ks[4], ks[5], H, 1)
    return w1, b1, w2, b2, w3, b3


def slice_mlp_ref(x, w1, b1, w2, b2, w3, b3):
    h = jax.nn.gelu(x @ w1 + b1, approximate=False)
    h = jax.nn.gelu(h @ w2 + b2, approximate=False)
    return jax.nn.sigmoid(h @ w3 + b3)


if __name__ == "__main__":
    hidden_size = 32
    key = jax.random.PRNGKey(0)
    kx, kp = jax.random.split(key)
    params = init_params(kp, hidden_size)

    # Small single-tile case (batch=8).
    x_small = jax.random.normal(kx, (8, 2 * hidden_size), jnp.float32)
    out_small = slice_mlp(x_small, *params)
    jax.block_until_ready(out_small)
    ref_small = slice_mlp_ref(x_small, *params)
    assert out_small.shape == (8, 1)
    assert jnp.allclose(out_small, ref_small, atol=2e-2, rtol=2e-2)

    # Multi-tile case exercising the batch grid + tail padding (batch=200, TM=64).
    x_big = jax.random.normal(kx, (200, 2 * hidden_size), jnp.float32)
    out_big = slice_mlp(x_big, *params, tm=64)
    jax.block_until_ready(out_big)
    ref_big = slice_mlp_ref(x_big, *params)
    assert out_big.shape == (200, 1)
    assert jnp.allclose(out_big, ref_big, atol=2e-2, rtol=2e-2)

    print("KERNEL_OK")
</pallas_src>

<mosaic_0001>
module attributes {stable_mosaic.version = 11 : i64} {
  func.func @slice_mlp_kernel(%arg0: i32, %arg1: memref<8x64xf32, #tpu.memory_space<vmem>>, %arg2: memref<64x32xbf16, #tpu.memory_space<vmem>>, %arg3: memref<1x32xf32, #tpu.memory_space<vmem>>, %arg4: memref<32x32xbf16, #tpu.memory_space<vmem>>, %arg5: memref<1x32xf32, #tpu.memory_space<vmem>>, %arg6: memref<1x32xbf16, #tpu.memory_space<vmem>>, %arg7: memref<1x1xf32, #tpu.memory_space<vmem>>, %arg8: memref<1x1x8xf32, #tpu.memory_space<vmem>>) attributes {dimension_semantics = [#tpu.dimension_semantics<parallel>], iteration_bounds = array<i64: 1>, scalar_prefetch = 0 : i64, scratch_operands = 0 : i64, tpu.core_type = #tpu.core_type<tc>, window_params = [{transform_indices = @transform_0, window_bounds = array<i64: 8, 64>}, {pipeline_mode = #tpu.pipeline_mode<synchronous>, transform_indices = @transform_1, window_bounds = array<i64: 64, 32>}, {pipeline_mode = #tpu.pipeline_mode<synchronous>, transform_indices = @transform_2, window_bounds = array<i64: 1, 32>}, {pipeline_mode = #tpu.pipeline_mode<synchronous>, transform_indices = @transform_3, window_bounds = array<i64: 32, 32>}, {pipeline_mode = #tpu.pipeline_mode<synchronous>, transform_indices = @transform_4, window_bounds = array<i64: 1, 32>}, {pipeline_mode = #tpu.pipeline_mode<synchronous>, transform_indices = @transform_5, window_bounds = array<i64: 1, 32>}, {pipeline_mode = #tpu.pipeline_mode<synchronous>, transform_indices = @transform_6, window_bounds = array<i64: 1, 1>}, {transform_indices = @transform_7, window_bounds = array<i64: 1, 1, 8>}]} {
    %c0 = arith.constant 0 : index
    %c0_0 = arith.constant 0 : index
    %0 = vector.load %arg1[%c0, %c0_0] : memref<8x64xf32, #tpu.memory_space<vmem>>, vector<8x64xf32>
    %1 = arith.truncf %0 : vector<8x64xf32> to vector<8x64xbf16>
    %c0_1 = arith.constant 0 : index
    %c0_2 = arith.constant 0 : index
    %2 = vector.load %arg2[%c0_1, %c0_2] : memref<64x32xbf16, #tpu.memory_space<vmem>>, vector<64x32xbf16>
    %cst = arith.constant dense<0.000000e+00> : vector<8x32xf32>
    %3 = tpu.matmul %1, %2, %cst {dimension_numbers = #tpu.dot_dimension_numbers<[1], [0], [0], [1], [0, 0, 1, 1], [], []>} : vector<8x64xbf16>, vector<64x32xbf16>, vector<8x32xf32> -> vector<8x32xf32>
    %c0_3 = arith.constant 0 : index
    %c0_4 = arith.constant 0 : index
    %4 = vector.load %arg3[%c0_3, %c0_4] : memref<1x32xf32, #tpu.memory_space<vmem>>, vector<1x32xf32>
    %5 = vector.broadcast %4 : vector<1x32xf32> to vector<8x32xf32>
    %6 = arith.addf %3, %5 : vector<8x32xf32>
    %cst_5 = arith.constant 5.000000e-01 : f32
    %7 = vector.broadcast %cst_5 : f32 to vector<8x32xf32>
    %8 = arith.mulf %7, %6 : vector<8x32xf32>
    %cst_6 = arith.constant 0.707106769 : f32
    %9 = vector.broadcast %cst_6 : f32 to vector<8x32xf32>
    %10 = arith.mulf %6, %9 : vector<8x32xf32>
    %11 = math.absf %10 : vector<8x32xf32>
    %cst_7 = arith.constant 0.327591091 : f32
    %12 = vector.broadcast %cst_7 : f32 to vector<8x32xf32>
    %13 = arith.mulf %12, %11 : vector<8x32xf32>
    %cst_8 = arith.constant 1.000000e+00 : f32
    %14 = vector.broadcast %cst_8 : f32 to vector<8x32xf32>
    %15 = arith.addf %14, %13 : vector<8x32xf32>
    %cst_9 = arith.constant 1.000000e+00 : f32
    %16 = vector.broadcast %cst_9 : f32 to vector<8x32xf32>
    %17 = arith.divf %16, %15 : vector<8x32xf32>
    %cst_10 = arith.constant 1.06140542 : f32
    %18 = vector.broadcast %cst_10 : f32 to vector<8x32xf32>
    %19 = arith.mulf %18, %17 : vector<8x32xf32>
    %cst_11 = arith.constant -1.45315206 : f32
    %20 = vector.broadcast %cst_11 : f32 to vector<8x32xf32>
    %21 = arith.addf %19, %20 : vector<8x32xf32>
    %22 = arith.mulf %21, %17 : vector<8x32xf32>
    %cst_12 = arith.constant 1.42141378 : f32
    %23 = vector.broadcast %cst_12 : f32 to vector<8x32xf32>
    %24 = arith.addf %22, %23 : vector<8x32xf32>
    %25 = arith.mulf %24, %17 : vector<8x32xf32>
    %cst_13 = arith.constant -0.284496725 : f32
    %26 = vector.broadcast %cst_13 : f32 to vector<8x32xf32>
    %27 = arith.addf %25, %26 : vector<8x32xf32>
    %28 = arith.mulf %27, %17 : vector<8x32xf32>
    %cst_14 = arith.constant 0.254829586 : f32
    %29 = vector.broadcast %cst_14 : f32 to vector<8x32xf32>
    %30 = arith.addf %28, %29 : vector<8x32xf32>
    %31 = arith.mulf %30, %17 : vector<8x32xf32>
    %cst_15 = arith.constant 0.000000e+00 : f32
    %32 = vector.broadcast %cst_15 : f32 to vector<8x32xf32>
    %33 = arith.subf %32, %11 : vector<8x32xf32>
    %34 = arith.mulf %33, %11 : vector<8x32xf32>
    %35 = math.exp %34 : vector<8x32xf32>
    %36 = arith.mulf %31, %35 : vector<8x32xf32>
    %cst_16 = arith.constant 1.000000e+00 : f32
    %37 = vector.broadcast %cst_16 : f32 to vector<8x32xf32>
    %38 = arith.subf %37, %36 : vector<8x32xf32>
    %cst_17 = arith.constant 0.000000e+00 : f32
    %39 = vector.broadcast %cst_17 : f32 to vector<8x32xf32>
    %40 = arith.cmpf olt, %10, %39 : vector<8x32xf32>
    %cst_18 = arith.constant 0.000000e+00 : f32
    %41 = vector.broadcast %cst_18 : f32 to vector<8x32xf32>
    %42 = arith.subf %41, %38 : vector<8x32xf32>
    %43 = arith.select %40, %42, %38 : vector<8x32xi1>, vector<8x32xf32>
    %cst_19 = arith.constant 1.000000e+00 : f32
    %44 = vector.broadcast %cst_19 : f32 to vector<8x32xf32>
    %45 = arith.addf %44, %43 : vector<8x32xf32>
    %46 = arith.mulf %8, %45 : vector<8x32xf32>
    %47 = arith.truncf %46 : vector<8x32xf32> to vector<8x32xbf16>
    %c0_20 = arith.constant 0 : index
    %c0_21 = arith.constant 0 : index
    %48 = vector.load %arg4[%c0_20, %c0_21] : memref<32x32xbf16, #tpu.memory_space<vmem>>, vector<32x32xbf16>
    %cst_22 = arith.constant dense<0.000000e+00> : vector<8x32xf32>
    %49 = tpu.matmul %47, %48, %cst_22 {dimension_numbers = #tpu.dot_dimension_numbers<[1], [0], [0], [1], [0, 0, 1, 1], [], []>} : vector<8x32xbf16>, vector<32x32xbf16>, vector<8x32xf32> -> vector<8x32xf32>
    %c0_23 = arith.constant 0 : index
    %c0_24 = arith.constant 0 : index
    %50 = vector.load %arg5[%c0_23, %c0_24] : memref<1x32xf32, #tpu.memory_space<vmem>>, vector<1x32xf32>
    %51 = vector.broadcast %50 : vector<1x32xf32> to vector<8x32xf32>
    %52 = arith.addf %49, %51 : vector<8x32xf32>
    %cst_25 = arith.constant 5.000000e-01 : f32
    %53 = vector.broadcast %cst_25 : f32 to vector<8x32xf32>
    %54 = arith.mulf %53, %52 : vector<8x32xf32>
    %cst_26 = arith.constant 0.707106769 : f32
    %55 = vector.broadcast %cst_26 : f32 to vector<8x32xf32>
    %56 = arith.mulf %52, %55 : vector<8x32xf32>
    %57 = math.absf %56 : vector<8x32xf32>
    %cst_27 = arith.constant 0.327591091 : f32
    %58 = vector.broadcast %cst_27 : f32 to vector<8x32xf32>
    %59 = arith.mulf %58, %57 : vector<8x32xf32>
    %cst_28 = arith.constant 1.000000e+00 : f32
    %60 = vector.broadcast %cst_28 : f32 to vector<8x32xf32>
    %61 = arith.addf %60, %59 : vector<8x32xf32>
    %cst_29 = arith.constant 1.000000e+00 : f32
    %62 = vector.broadcast %cst_29 : f32 to vector<8x32xf32>
    %63 = arith.divf %62, %61 : vector<8x32xf32>
    %cst_30 = arith.constant 1.06140542 : f32
    %64 = vector.broadcast %cst_30 : f32 to vector<8x32xf32>
    %65 = arith.mulf %64, %63 : vector<8x32xf32>
    %cst_31 = arith.constant -1.45315206 : f32
    %66 = vector.broadcast %cst_31 : f32 to vector<8x32xf32>
    %67 = arith.addf %65, %66 : vector<8x32xf32>
    %68 = arith.mulf %67, %63 : vector<8x32xf32>
    %cst_32 = arith.constant 1.42141378 : f32
    %69 = vector.broadcast %cst_32 : f32 to vector<8x32xf32>
    %70 = arith.addf %68, %69 : vector<8x32xf32>
    %71 = arith.mulf %70, %63 : vector<8x32xf32>
    %cst_33 = arith.constant -0.284496725 : f32
    %72 = vector.broadcast %cst_33 : f32 to vector<8x32xf32>
    %73 = arith.addf %71, %72 : vector<8x32xf32>
    %74 = arith.mulf %73, %63 : vector<8x32xf32>
    %cst_34 = arith.constant 0.254829586 : f32
    %75 = vector.broadcast %cst_34 : f32 to vector<8x32xf32>
    %76 = arith.addf %74, %75 : vector<8x32xf32>
    %77 = arith.mulf %76, %63 : vector<8x32xf32>
    %cst_35 = arith.constant 0.000000e+00 : f32
    %78 = vector.broadcast %cst_35 : f32 to vector<8x32xf32>
    %79 = arith.subf %78, %57 : vector<8x32xf32>
    %80 = arith.mulf %79, %57 : vector<8x32xf32>
    %81 = math.exp %80 : vector<8x32xf32>
    %82 = arith.mulf %77, %81 : vector<8x32xf32>
    %cst_36 = arith.constant 1.000000e+00 : f32
    %83 = vector.broadcast %cst_36 : f32 to vector<8x32xf32>
    %84 = arith.subf %83, %82 : vector<8x32xf32>
    %cst_37 = arith.constant 0.000000e+00 : f32
    %85 = vector.broadcast %cst_37 : f32 to vector<8x32xf32>
    %86 = arith.cmpf olt, %56, %85 : vector<8x32xf32>
    %cst_38 = arith.constant 0.000000e+00 : f32
    %87 = vector.broadcast %cst_38 : f32 to vector<8x32xf32>
    %88 = arith.subf %87, %84 : vector<8x32xf32>
    %89 = arith.select %86, %88, %84 : vector<8x32xi1>, vector<8x32xf32>
    %cst_39 = arith.constant 1.000000e+00 : f32
    %90 = vector.broadcast %cst_39 : f32 to vector<8x32xf32>
    %91 = arith.addf %90, %89 : vector<8x32xf32>
    %92 = arith.mulf %54, %91 : vector<8x32xf32>
    %c0_40 = arith.constant 0 : index
    %c0_41 = arith.constant 0 : index
    %93 = vector.load %arg6[%c0_40, %c0_41] : memref<1x32xbf16, #tpu.memory_space<vmem>>, vector<1x32xbf16>
    %94 = arith.truncf %92 : vector<8x32xf32> to vector<8x32xbf16>
    %cst_42 = arith.constant dense<0.000000e+00> : vector<1x8xf32>
    %95 = tpu.matmul %93, %94, %cst_42 {dimension_numbers = #tpu.dot_dimension_numbers<[1], [1], [0], [0], [0, 0, 1, 0], [], []>} : vector<1x32xbf16>, vector<8x32xbf16>, vector<1x8xf32> -> vector<1x8xf32>
    %c0_43 = arith.constant 0 : index
    %c0_44 = arith.constant 0 : index
    %96 = vector.load %arg7[%c0_43, %c0_44] : memref<1x1xf32, #tpu.memory_space<vmem>>, vector<1x1xf32>
    %97 = vector.broadcast %96 : vector<1x1xf32> to vector<1x8xf32>
    %98 = arith.addf %95, %97 : vector<1x8xf32>
    %99 = arith.negf %98 : vector<1x8xf32>
    %100 = math.exp %99 : vector<1x8xf32>
    %cst_45 = arith.constant 1.000000e+00 : f32
    %101 = vector.broadcast %cst_45 : f32 to vector<1x8xf32>
    %102 = arith.addf %101, %100 : vector<1x8xf32>
    %103 = arith.divf %101, %102 : vector<1x8xf32>
    %104 = vector.shape_cast %103 : vector<1x8xf32> to vector<1x1x8xf32>
    %c0_46 = arith.constant 0 : index
    %c0_47 = arith.constant 0 : index
    %c0_48 = arith.constant 0 : index
    %105 = vector.load %arg8[%c0_46, %c0_47, %c0_48] : memref<1x1x8xf32, #tpu.memory_space<vmem>>, vector<1x1x8xf32>
    tpu.vector_store %arg8[%c0_46, %c0_47, %c0_48], %104 {strides = array<i32>} : memref<1x1x8xf32, #tpu.memory_space<vmem>>, vector<1x1x8xf32>,
    return
  }
  func.func @transform_0(%arg0: i32) -> (i32, i32) {
    %c0_i32 = arith.constant 0 : i32
    %c0_i32_0 = arith.constant 0 : i32
    return %arg0, %c0_i32 : i32, i32
  }
  func.func @transform_1(%arg0: i32) -> (i32, i32) {
    %c0_i32 = arith.constant 0 : i32
    %c0_i32_0 = arith.constant 0 : i32
    %c0_i32_1 = arith.constant 0 : i32
    return %c0_i32, %c0_i32_0 : i32, i32
  }
  func.func @transform_2(%arg0: i32) -> (i32, i32) {
    %c0_i32 = arith.constant 0 : i32
    %c0_i32_0 = arith.constant 0 : i32
    %c0_i32_1 = arith.constant 0 : i32
    return %c0_i32, %c0_i32_0 : i32, i32
  }
  func.func @transform_3(%arg0: i32) -> (i32, i32) {
    %c0_i32 = arith.constant 0 : i32
    %c0_i32_0 = arith.constant 0 : i32
    %c0_i32_1 = arith.constant 0 : i32
    return %c0_i32, %c0_i32_0 : i32, i32
  }
  func.func @transform_4(%arg0: i32) -> (i32, i32) {
    %c0_i32 = arith.constant 0 : i32
    %c0_i32_0 = arith.constant 0 : i32
    %c0_i32_1 = arith.constant 0 : i32
    return %c0_i32, %c0_i32_0 : i32, i32
  }
  func.func @transform_5(%arg0: i32) -> (i32, i32) {
    %c0_i32 = arith.constant 0 : i32
    %c0_i32_0 = arith.constant 0 : i32
    %c0_i32_1 = arith.constant 0 : i32
    return %c0_i32, %c0_i32_0 : i32, i32
  }
  func.func @transform_6(%arg0: i32) -> (i32, i32) {
    %c0_i32 = arith.constant 0 : i32
    %c0_i32_0 = arith.constant 0 : i32
    %c0_i32_1 = arith.constant 0 : i32
    return %c0_i32, %c0_i32_0 : i32, i32
  }
  func.func @transform_7(%arg0: i32) -> (i32, i32, i32) {
    %c0_i32 = arith.constant 0 : i32
    %c0_i32_0 = arith.constant 0 : i32
    %c0_i32_1 = arith.constant 0 : i32
    return %arg0, %c0_i32, %c0_i32_0 : i32, i32, i32
  }
}

</mosaic_0001>

<bundles_post_ra>
// kernel: tpu_custom_call.1
= control target key start
LH: loop header
LB: loop body
LE: loop exit
PB: predicated region body
PF: predicated region fallthrough
CT: control target
= control target key end

     0   :  { %s426_s0 = inlined_call_operand.vmem [shape: f32[8,64], index: 0, kind: input, shape index: {}]   ;;  %s427_s1 = inlined_call_operand.vmem [shape: bf16[64,32], index: 1, kind: input, shape index: {}]   ;;  %s428_s2 = inlined_call_operand.vmem [shape: f32[1,32], index: 2, kind: input, shape index: {}]   ;;  %s429_s3 = inlined_call_operand.vmem [shape: bf16[32,32], index: 3, kind: input, shape index: {}]   ;;  %s430_s4 = inlined_call_operand.vmem [shape: f32[1,32], index: 4, kind: input, shape index: {}]   ;;  %s431_s5 = inlined_call_operand.vmem [shape: bf16[1,32], index: 5, kind: input, shape index: {}]   ;;  %s432_s6 = inlined_call_operand.<no memory space> [shape: f32[1,1], index: 6, kind: input, shape index: {}]   ;;  %s433_s7 = inlined_call_operand.hbm [shape: f32[1,1,8], index: 7, kind: output, shape index: {}]  }
   0x1   :  { %v12_v0 = vstv %s432_s6 }
   0x2   :  { %13 = vst [vmem:[#allocation2] sm:$0x1] %v12_v0 }
   0x3   :  { %v299_v1 = vld [vmem:[%s427_s1 + $0x18] sm:$0xff]  ;;  %v298_v2 = vld [vmem:[%s427_s1 + $0x10] sm:$0xff] }
   0x4   :  { %76 = vmatpush.bf16.msra.mxu0 %v299_v1 }
   0x5   :  { %14 = vsyncpa [#allocation4], 0  ;;  %v297_v3 = vld [vmem:[%s427_s1 + $0x8] sm:$0xff]  ;;  %v296_v4 = vld [vmem:[%s427_s1] sm:$0xff]  ;;  %vm68_vm0 = vcmask 523264   ;;  %vm146_vm6 = vcmask 261120  }
   0x6   :  { %v30_v5 = vld [vmem:[%s426_s0] sm:$0xff]  ;;  %v301_v7 = vld [vmem:[%s429_s3 + $0x8] sm:$0xff]  ;;  %s259_s20 = sshll.u32 %s433_s7, 4  ;;  %vm250_vm15 = vcmask 57344   ;;  %s260_s20 = int_to_ptr.hbm [resolvable:$true] %s259_s20 }
   0x7   :  { %v31_v6 = vpack.c.bf16 %v30_v5, %v30_v5  ;;  %156 = vmatpush.bf16.msra.mxu1 %v301_v7  ;;  %v300_v8 = vld [vmem:[%s429_s3] sm:$0xff] }
   0x8   :  { %77 = vmatpush.bf16.msra.mxu0 %v298_v2  ;;  %v305_v9 = vld [vmem:[%s428_s2] ss:$0 sm:$0xff] }
   0x9   :  { %v306_v48 = vld [vmem:[%s430_s4] ss:$0 sm:$0xff]  ;;  %s346_s4 = smov [#allocation3]  }
   0xb   :  { %157 = vmatpush.bf16.msra.mxu1 %v300_v8 }
   0xc   :  { %78 = vmatpush.bf16.msra.mxu0 %v297_v3 }
  0x10   :  { %79 = vmatpush.bf16.msra.mxu0 %v296_v4 }
  0x13   :  { %284 = vmatmul.msk.bf16.vlgmr.msra.gmra.mxu0 %vm68_vm0, %v31_v6 }
  0x90   :  { %v81_v10 = vpop.f32.mrf.mxu0 }
  0x91   :  { %v82_v11 = vadd.f32 %v305_v9, %v81_v10  ;;  %v205_v9 = vld [vmem:[#allocation2] sm:$0x1] }
  0x93   :  { %v86_v12 = vmul.f32 0.70710677, %v82_v11  ;;  %v85_v44 = vmul.f32 0.5, %v82_v11  ;;  %v345_v11 = vmov 0  }
  0x94   :  { %304 = vset.pattern.permute.xlu0 %v345_v11 }
  0x95   :  { %v87_v13 = vand.u32 2147483647, %v86_v12  ;;  %vm120_vm5 = vcmp.lt.f32.partialorder %v86_v12, 0.0  ;;  %208 = vperm.xlu0 %304, %v205_v9  }
  0x97   :  { %v88_v14 = vmul.f32 0.3275911, %v87_v13  ;;  %v114_v26 = vsub.f32 0.0, %v87_v13 }
  0x98   :  { %v83_v15 = vpop.f32.mrf.mxu0 }
  0x99   :  { %v89_v16 = vadd.f32 1.0, %v88_v14  ;;  %v115_v30 = vmul.f32 %v114_v26, %v87_v13  ;;  %v203_v26 = vld [vmem:[%s431_s5] sm:$0x1]  ;;  %s257_s5 = sshll.u32 %s346_s4, 4  ;;  %s258_s5 = int_to_ptr.vmem [resolvable:$true] %s257_s5 }
  0x9b   :  { %307 = vrcp.f32 %v89_v16  ;;  %v101_v20 = vand.u32 2147483648, %v89_v16  ;;  %v99_v22 = vand.u32 2147483647, %v89_v16  ;;  %vm95_vm2 = vweird.f32 %v89_v16 }
  0x9c   :  { %v116_v33 = vmul.f32 1.442695, %v115_v30 }
  0x9d   :  { %v102_v24 = vor.u32 1.1754944e-38, %v101_v20  ;;  %vm100_vm4 = vcmp.eq.f32.partialorder %v99_v22, 8.507059e+37 }
  0x9e   :  { %309 = vpow2.f32 %v116_v33 }
  0xa1   :  { %v308_v17 = vpop.eup %307 }
  0xa2   :  { %v91_v18 = vmul.f32 %v308_v17, %v89_v16  ;;  %vm96_vm1 = vweird.f32 %v308_v17 }
  0xa3   :  { %vm97_vm3 = vmor %vm95_vm2, %vm96_vm1 }
  0xa4   :  { %v92_v19 = vsub.f32 1.0, %v91_v18  ;;  %v310_v39 = vpop.eup %309 }
  0xa6   :  { %v93_v21 = vmul.f32 %v308_v17, %v92_v19 }
  0xa8   :  { %v94_v23 = vadd.f32 %v308_v17, %v93_v21 }
  0xaa   :  { %v98_v25 = vsel %vm97_vm3, %v308_v17, %v94_v23 }
  0xab   :  { %v103_v27 = vsel %vm100_vm4, %v102_v24, %v98_v25 }
  0xac   :  { %v105_v28 = vmul.f32 1.0614054, %v103_v27 }
  0xae   :  { %v106_v29 = vadd.f32 -1.4531521, %v105_v28 }
  0xb0   :  { %v107_v31 = vmul.f32 %v106_v29, %v103_v27 }
  0xb2   :  { %v108_v32 = vadd.f32 1.4214138, %v107_v31 }
  0xb4   :  { %v109_v34 = vmul.f32 %v108_v32, %v103_v27 }
  0xb6   :  { %v110_v35 = vadd.f32 -0.28449672, %v109_v34 }
  0xb8   :  { %v111_v36 = vmul.f32 %v110_v35, %v103_v27 }
  0xba   :  { %v112_v37 = vadd.f32 0.2548296, %v111_v36 }
  0xbc   :  { %v113_v38 = vmul.f32 %v112_v37, %v103_v27 }
  0xbe   :  { %v118_v40 = vmul.f32 %v310_v39, %v113_v38 }
  0xc0   :  { %v119_v41 = vsub.f32 1.0, %v118_v40 }
  0xc2   :  { %v121_v42 = vsub.f32 0.0, %v119_v41 }
  0xc4   :  { %v122_v43 = vsel %vm120_vm5, %v121_v42, %v119_v41 }
  0xc5   :  { %v123_v45 = vadd.f32 1.0, %v122_v43 }
  0xc7   :  { %v124_v46 = vmul.f32 %v123_v45, %v85_v44 }
  0xc9   :  { %v125_v47 = vpack.c.bf16 %v124_v46, %v124_v46 }
  0xcb   :  { %293 = vmatmul.msk.bf16.vlgmr.msra.gmra.mxu1 %vm146_vm6, %v125_v47 }
 0x107   :  { %v209_v27 = vpop.permute.xlu0 %208 }
 0x108   :  { %v211_v28 = vperm.slane %v209_v27, 0 }
 0x148   :  { %v159_v49 = vpop.f32.mrf.mxu1 }
 0x149   :  { %v160_v50 = vadd.f32 %v306_v48, %v159_v49 }
 0x14b   :  { %v164_v51 = vmul.f32 0.70710677, %v160_v50  ;;  %v163_v21 = vmul.f32 0.5, %v160_v50 }
 0x14d   :  { %v165_v52 = vand.u32 2147483647, %v164_v51  ;;  %vm198_vm11 = vcmp.lt.f32.partialorder %v164_v51, 0.0 }
 0x14f   :  { %v166_v53 = vmul.f32 0.3275911, %v165_v52  ;;  %v192_v1 = vsub.f32 0.0, %v165_v52 }
 0x150   :  { %v161_v54 = vpop.f32.mrf.mxu1 }
 0x151   :  { %v167_v55 = vadd.f32 1.0, %v166_v53  ;;  %v193_v5 = vmul.f32 %v192_v1, %v165_v52 }
 0x153   :  { %311 = vrcp.f32 %v167_v55  ;;  %v179_v59 = vand.u32 2147483648, %v167_v55  ;;  %v177_v61 = vand.u32 2147483647, %v167_v55  ;;  %vm173_vm8 = vweird.f32 %v167_v55 }
 0x154   :  { %v194_v8 = vmul.f32 1.442695, %v193_v5 }
 0x155   :  { %v180_v63 = vor.u32 1.1754944e-38, %v179_v59  ;;  %vm178_vm10 = vcmp.eq.f32.partialorder %v177_v61, 8.507059e+37 }
 0x156   :  { %313 = vpow2.f32 %v194_v8 }
 0x159   :  { %v312_v56 = vpop.eup %311 }
 0x15a   :  { %v169_v57 = vmul.f32 %v312_v56, %v167_v55  ;;  %vm174_vm7 = vweird.f32 %v312_v56 }
 0x15b   :  { %vm175_vm9 = vmor %vm173_vm8, %vm174_vm7 }
 0x15c   :  { %v170_v58 = vsub.f32 1.0, %v169_v57  ;;  %v314_v16 = vpop.eup %313 }
 0x15e   :  { %v171_v60 = vmul.f32 %v312_v56, %v170_v58 }
 0x160   :  { %v172_v62 = vadd.f32 %v312_v56, %v171_v60 }
 0x162   :  { %v176_v0 = vsel %vm175_vm9, %v312_v56, %v172_v62 }
 0x163   :  { %v181_v2 = vsel %vm178_vm10, %v180_v63, %v176_v0 }
 0x164   :  { %v183_v3 = vmul.f32 1.0614054, %v181_v2 }
 0x166   :  { %v184_v4 = vadd.f32 -1.4531521, %v183_v3 }
 0x168   :  { %v185_v6 = vmul.f32 %v184_v4, %v181_v2 }
 0x16a   :  { %v186_v7 = vadd.f32 1.4214138, %v185_v6 }
 0x16c   :  { %v187_v10 = vmul.f32 %v186_v7, %v181_v2 }
 0x16e   :  { %v188_v12 = vadd.f32 -0.28449672, %v187_v10 }
 0x170   :  { %v189_v13 = vmul.f32 %v188_v12, %v181_v2 }
 0x172   :  { %v190_v14 = vadd.f32 0.2548296, %v189_v13 }
 0x174   :  { %v191_v15 = vmul.f32 %v190_v14, %v181_v2 }
 0x176   :  { %v196_v17 = vmul.f32 %v314_v16, %v191_v15 }
 0x178   :  { %v197_v18 = vsub.f32 1.0, %v196_v17 }
 0x17a   :  { %v199_v19 = vsub.f32 0.0, %v197_v18 }
 0x17c   :  { %v200_v20 = vsel %vm198_vm11, %v199_v19, %v197_v18 }
 0x17d   :  { %v201_v22 = vadd.f32 1.0, %v200_v20 }
 0x17f   :  { %v202_v23 = vmul.f32 %v201_v22, %v163_v21 }
 0x181   :  { %v204_v24 = vpack.c.bf16 %v202_v23, %v202_v23 }
 0x183   :  { %v216_v25 = vsel %vm146_vm6, %v204_v24, 0 }
 0x184   :  { %225 = vmatpush.bf16.xpose.msra.mxu2 %v216_v25 }
 0x18b   :  { %294 = vmatmul.msk.bf16.vlgmr.msra.gmra.mxu2 %vm146_vm6, %v203_v26 }
 0x20e   :  { %v227_v29 = vpop.f32.mrf.mxu2 }
 0x20f   :  { %v228_v30 = vadd.f32 %v227_v29, %v211_v28 }
 0x211   :  { %v295_v31 = vmul.f32 -1.442695, %v228_v30 }
 0x213   :  { %315 = vpow2.f32 %v295_v31 }
 0x216   :  { %v229_v32 = vpop.f32.mrf.mxu2 }
 0x219   :  { %v316_v33 = vpop.eup %315 }
 0x21a   :  { %v234_v34 = vadd.f32 1.0, %v316_v33 }
 0x21c   :  { %317 = vrcp.f32 %v234_v34  ;;  %v246_v38 = vand.u32 2147483648, %v234_v34  ;;  %v244_v40 = vand.u32 2147483647, %v234_v34  ;;  %vm240_vm13 = vweird.f32 %v234_v34 }
 0x21e   :  { %v247_v42 = vor.u32 1.1754944e-38, %v246_v38  ;;  %vm245_vm0 = vcmp.eq.f32.partialorder %v244_v40, 8.507059e+37 }
 0x222   :  { %v318_v35 = vpop.eup %317 }
 0x223   :  { %v236_v36 = vmul.f32 %v318_v35, %v234_v34  ;;  %vm241_vm12 = vweird.f32 %v318_v35 }
 0x224   :  { %vm242_vm14 = vmor %vm240_vm13, %vm241_vm12 }
 0x225   :  { %v237_v37 = vsub.f32 1.0, %v236_v36 }
 0x227   :  { %v238_v39 = vmul.f32 %v318_v35, %v237_v37 }
 0x229   :  { %v239_v41 = vadd.f32 %v318_v35, %v238_v39 }
 0x22b   :  { %v243_v43 = vsel %vm242_vm14, %v318_v35, %v239_v41 }
 0x22c   :  { %v248_v44 = vsel %vm245_vm0, %v247_v42, %v243_v43 }
 0x22d   :  { %251 = vst.msk [vmem:[#allocation3] sm:$0x1] %vm250_vm15, %v248_v44 }
 0x22e   :  { %262 = dma.vmem_to_hbm [thread:$0]  %s258_s5, 16, %s260_s20, [#allocation4]  }
 0x22f   :  { %343 = dma.done.wait [#allocation4], 16  }
 0x230   :  { %344 = vsyncadd [#allocation4], 4294967280 }
 0x231   :  { %267 = vsyncpa [#allocation4], 1 }

</bundles_post_ra>
